<compile_context>
chip_gen: v7x
topology: tpu7x:2x2x1
jax: 0.10.0
libtpu: 0.0.40
codegen_flags: <defaults>
</compile_context>

<pallas_src>
import jax
import jax.numpy as jnp
from jax.experimental import pallas as pl
from jax.experimental.pallas import tpu as pltpu

LRELU_SLOPE = 0.2
BN_EPS = 1e-5

CHAN_ALIGN = 8          # channel padding granularity (sublane-friendly)
LANE = 128              # lane width; used for large-Cout lane-dense stores
SUBLANE = 16            # bf16 sublane packing; M tiles are multiples of this


def _round_up(x, m):
    return ((x + m - 1) // m) * m


def _store_width(cout):
    # Narrow masked stores beat writing 128 padded lanes to HBM for small Cout
    # on these mem-bound layers; keep lane-dense 128 once Cout >= 64.
    if cout >= 64:
        return _round_up(cout, LANE)
    return _round_up(cout, CHAN_ALIGN)


def _tpu_memory_config():
    """Generation-aware VMEM budget / scoped limit / patch-buffer depth."""
    vmem_phys = 0
    try:
        info = pltpu.get_tpu_info()
        for name in ("vmem_capacity_bytes", "vmem_size_bytes", "vmem_bytes"):
            v = getattr(info, name, None)
            if v:
                vmem_phys = int(v)
                break
    except Exception:
        vmem_phys = 0
    if vmem_phys >= (100 << 20):          # v5e / v6e: 128 MiB physical VMEM
        return dict(budget=48 << 20, limit=96 << 20, patch_bufs=2)
    # v7x (64 MiB physical) or unknown: stay conservative, buffer deeper.
    return dict(budget=20 << 20, limit=40 << 20, patch_bufs=3)


def _pick_tile_m(m, k_dim, cout_p, out_bytes, budget, patch_bufs):
    """Largest M tile (multiple of 16) whose pipelined working set fits the budget."""
    m_cap = _round_up(m, SUBLANE)
    for t in (1024, 512, 256, 128, 64, 32, 16):
        if t > m_cap:
            continue
        need = (patch_bufs * t * k_dim * 2       # bf16 patch tile, multi-buffered
                + 2 * t * cout_p * out_bytes     # output tile, double-buffered
                + 2 * k_dim * cout_p * 2)        # resident bf16 weight (2x safety)
        if need <= budget:
            return t
    return SUBLANE


# ----------------------------- Pallas kernels ------------------------------

def _conv_lrelu_kernel(p_ref, w_ref, o_ref):
    # (TILE_M, K) @ (K, Cout) on the MXU (bf16 in, f32 acc); LeakyReLU on the VPU.
    y = jnp.dot(p_ref[...], w_ref[...], preferred_element_type=jnp.float32)
    o_ref[...] = jnp.where(y > 0, y, LRELU_SLOPE * y).astype(o_ref.dtype)


def _matmul_kernel(p_ref, w_ref, o_ref):
    # Final conv (kernel == spatial size, pad 0) is a plain dense matmul.
    o_ref[...] = jnp.dot(p_ref[...], w_ref[...],
                         preferred_element_type=jnp.float32).astype(o_ref.dtype)


def _make_conv_bn_lrelu_fused_kernel(m_true):
    # Whole BN layer in one call when the layer fits a single M tile:
    # GEMM + batch stats + normalize + LeakyReLU (stats in f32, bf16 store).
    inv_m = 1.0 / float(m_true)

    def kernel(p_ref, w_ref, o_ref):
        y = jnp.dot(p_ref[...], w_ref[...], preferred_element_type=jnp.float32)
        mean = jnp.sum(y, axis=0, keepdims=True) * inv_m
        ex2 = jnp.sum(y * y, axis=0, keepdims=True) * inv_m
        var = jnp.maximum(ex2 - mean * mean, 0.0)   # biased, as torch training BN
        scale = jax.lax.rsqrt(var + BN_EPS)
        yn = (y - mean) * scale
        o_ref[...] = jnp.where(yn > 0, yn, LRELU_SLOPE * yn).astype(o_ref.dtype)

    return kernel


def _conv_stats_kernel(p_ref, w_ref, y_ref, stats_ref):
    # BN pass 1 (tiled): GEMM + per-tile partial sum / sumsq.  No cross-iteration
    # accumulation, so the grid axis stays "parallel" (megacore-friendly on v7x).
    y = jnp.dot(p_ref[...], w_ref[...], preferred_element_type=jnp.float32)
    y_ref[...] = y.astype(y_ref.dtype)
    s = jnp.sum(y, axis=0, keepdims=True)          # (1, C) f32
    ss = jnp.sum(y * y, axis=0, keepdims=True)     # (1, C) f32
    row = jax.lax.broadcasted_iota(jnp.int32, (8, y.shape[1]), 0)
    stats_ref[0] = jnp.where(row == 0, s, jnp.where(row == 1, ss, jnp.zeros_like(s)))


def _make_bn_lrelu_kernel(m_true):
    # BN pass 2 (tiled): reduce the tiny per-tile partials, normalize with the
    # *true* row count, LeakyReLU.  gamma=1/beta=0 (default init) folded away.
    inv_m = 1.0 / float(m_true)

    def kernel(y_ref, stats_ref, o_ref):
        red = jnp.sum(stats_ref[...], axis=0)       # (8, C): row0=sum, row1=ssq
        mean = red[0:1, :] * inv_m
        ex2 = red[1:2, :] * inv_m
        var = jnp.maximum(ex2 - mean * mean, 0.0)
        scale = jax.lax.rsqrt(var + BN_EPS)
        yn = (y_ref[...].astype(jnp.float32) - mean) * scale
        o_ref[...] = jnp.where(yn > 0, yn, LRELU_SLOPE * yn).astype(o_ref.dtype)

    return kernel


# ------------------------------ Pallas wrappers -----------------------------

def _cparams(sem, mem_cfg):
    return pltpu.CompilerParams(dimension_semantics=sem,
                                vmem_limit_bytes=mem_cfg['limit'])


def _cost(m, k, c, out_bytes, extra_bytes=0):
    return pl.CostEstimate(flops=2 * m * k * c, transcendentals=0,
                           bytes_accessed=m * k * 2 + k * c * 2
                           + m * c * out_bytes + extra_bytes)


def _patch_spec(tile_m, k_dim, steps, patch_bufs):
    idx = lambda i: (i, 0)
    # Deeper patch buffering only when there are enough grid steps to hide the
    # DMA (v7x-style config); guarded so older jax without Buffered still works.
    if patch_bufs > 2 and steps > 2 and hasattr(pl, "Buffered"):
        try:
            return pl.BlockSpec((tile_m, k_dim), idx,
                                pipeline_mode=pl.Buffered(patch_bufs))
        except TypeError:
            pass
    return pl.BlockSpec((tile_m, k_dim), idx)


def conv_lrelu_pallas(cols, w2d, tile_m, mem_cfg):
    m_pad, k_dim = cols.shape
    cout_p = w2d.shape[1]
    steps = m_pad // tile_m
    return pl.pallas_call(
        _conv_lrelu_kernel,
        grid=(steps,),
        out_shape=jax.ShapeDtypeStruct((m_pad, cout_p), jnp.bfloat16),
        in_specs=[_patch_spec(tile_m, k_dim, steps, mem_cfg['patch_bufs']),
                  pl.BlockSpec((k_dim, cout_p), lambda i: (0, 0))],
        out_specs=pl.BlockSpec((tile_m, cout_p), lambda i: (i, 0)),
        compiler_params=_cparams(("parallel",), mem_cfg),
        cost_estimate=_cost(m_pad, k_dim, cout_p, 2),
    )(cols, w2d)


def conv_bn_lrelu_pallas(cols, w2d, tile_m, m_true, mem_cfg):
    m_pad, k_dim = cols.shape
    cout_p = w2d.shape[1]
    steps = m_pad // tile_m

    if steps == 1:
        # Single-tile layer: one fused pallas_call (GEMM + stats + BN + LeakyReLU).
        return pl.pallas_call(
            _make_conv_bn_lrelu_fused_kernel(m_true),
            grid=(1,),
            out_shape=jax.ShapeDtypeStruct((m_pad, cout_p), jnp.bfloat16),
            in_specs=[pl.BlockSpec((tile_m, k_dim), lambda i: (i, 0)),
                      pl.BlockSpec((k_dim, cout_p), lambda i: (0, 0))],
            out_specs=pl.BlockSpec((tile_m, cout_p), lambda i: (i, 0)),
            compiler_params=_cparams(("arbitrary",), mem_cfg),
            cost_estimate=_cost(m_pad, k_dim, cout_p, 2),
        )(cols, w2d)

    # Pass 1: tiled GEMM + per-tile partial stats, fully parallel over M tiles.
    y, stats = pl.pallas_call(
        _conv_stats_kernel,
        grid=(steps,),
        out_shape=(jax.ShapeDtypeStruct((m_pad, cout_p), jnp.bfloat16),
                   jax.ShapeDtypeStruct((steps, 8, cout_p), jnp.float32)),
        in_specs=[_patch_spec(tile_m, k_dim, steps, mem_cfg['patch_bufs']),
                  pl.BlockSpec((k_dim, cout_p), lambda i: (0, 0))],
        out_specs=(pl.BlockSpec((tile_m, cout_p), lambda i: (i, 0)),
                   pl.BlockSpec((1, 8, cout_p), lambda i: (i, 0, 0))),
        compiler_params=_cparams(("parallel",), mem_cfg),
        cost_estimate=_cost(m_pad, k_dim, cout_p, 2,
                            extra_bytes=steps * 8 * cout_p * 4),
    )(cols, w2d)

    # Pass 2: reduce the tiny partials + normalize + LeakyReLU, parallel over tiles.
    return pl.pallas_call(
        _make_bn_lrelu_kernel(m_true),
        grid=(steps,),
        out_shape=jax.ShapeDtypeStruct((m_pad, cout_p), jnp.bfloat16),
        in_specs=[pl.BlockSpec((tile_m, cout_p), lambda i: (i, 0)),
                  pl.BlockSpec((steps, 8, cout_p), lambda i: (0, 0, 0))],
        out_specs=pl.BlockSpec((tile_m, cout_p), lambda i: (i, 0)),
        compiler_params=_cparams(("parallel",), mem_cfg),
        cost_estimate=pl.CostEstimate(flops=3 * m_pad * cout_p,
                                      transcendentals=cout_p,
                                      bytes_accessed=2 * m_pad * cout_p * 2),
    )(y, stats)


def matmul_pallas(cols, w2d, tile_m, mem_cfg):
    m_pad, k_dim = cols.shape
    cout_p = w2d.shape[1]
    steps = m_pad // tile_m
    return pl.pallas_call(
        _matmul_kernel,
        grid=(steps,),
        out_shape=jax.ShapeDtypeStruct((m_pad, cout_p), jnp.float32),
        in_specs=[_patch_spec(tile_m, k_dim, steps, mem_cfg['patch_bufs']),
                  pl.BlockSpec((k_dim, cout_p), lambda i: (0, 0))],
        out_specs=pl.BlockSpec((tile_m, cout_p), lambda i: (i, 0)),
        compiler_params=_cparams(("parallel",), mem_cfg),
        cost_estimate=_cost(m_pad, k_dim, cout_p, 4),
    )(cols, w2d)


# ------------------------------ JAX glue (im2col) ---------------------------
# TODO(synk): replace with in-kernel im2col (strided pl.ds windows -> VMEM
#             patch scratch) so the patch matrix never touches HBM.

def im2col_nhwc(x, kh, kw, stride, pad):
    """x: (N, H, W, C) -> patches (N*Ho*Wo, kh*kw*C), plus Ho, Wo."""
    n, h, w, c = x.shape
    if pad:
        x = jnp.pad(x, ((0, 0), (pad, pad), (pad, pad), (0, 0)))
    ho = (h + 2 * pad - kh) // stride + 1
    wo = (w + 2 * pad - kw) // stride + 1
    cols = []
    for i in range(kh):
        for j in range(kw):
            cols.append(x[:, i:i + stride * (ho - 1) + 1:stride,
                          j:j + stride * (wo - 1) + 1:stride, :])
    p = jnp.stack(cols, axis=3)  # (N, Ho, Wo, kh*kw, C)
    return p.reshape(n * ho * wo, kh * kw * c), ho, wo


# ------------------------------ Encoder setup -------------------------------

def build_encoder_params(key, image_size, nf, hidden_size=None, nc=3):
    """Mirrors Encoder.__init__ layer construction (all convs bias=False)."""
    layers = [dict(type='conv_lrelu', cin=nc, cout=nf, k=4, s=2, p=1)]
    size, f = image_size, nf
    while True:
        size = size / 2
        if size > 4:
            layers.append(dict(type='conv_bn_lrelu', cin=f, cout=f * 2, k=4, s=2, p=1))
            f = f * 2
        else:
            if hidden_size is None:
                hidden_size = int(f)
            layers.append(dict(type='conv', cin=f, cout=hidden_size,
                               k=int(size), s=1, p=0))
            break

    params = []
    cin_p = _round_up(nc, CHAN_ALIGN)          # store width of the previous layer
    for i, l in enumerate(layers):
        kkey = jax.random.fold_in(key, i)
        w = 0.05 * jax.random.normal(
            kkey, (l['cout'], l['cin'], l['k'], l['k']), jnp.float32)

        cout_p = _store_width(l['cout'])
        # (Cout, Cin, kh, kw) -> (kh, kw, Cin, Cout); zero-pad Cin -> cin_p and
        # Cout -> cout_p (inert padding), then flatten to (kh*kw*cin_p, cout_p)
        # matching the im2col column order.
        w_t = jnp.transpose(w, (2, 3, 1, 0))
        w_t = jnp.pad(w_t, ((0, 0), (0, 0),
                            (0, cin_p - l['cin']), (0, cout_p - l['cout'])))
        k_dim = l['k'] * l['k'] * cin_p
        w2d = w_t.reshape(k_dim, cout_p).astype(jnp.bfloat16)

        params.append(dict(layer=l, w=w2d, cin_p=cin_p, cout_p=cout_p,
                           k_dim=k_dim, final=(l['type'] == 'conv')))
        cin_p = cout_p
    return params, hidden_size


def encoder_forward(x_nchw, params, mem_cfg):
    """Equivalent of Encoder.forward: returns (N, hidden_size) float32."""
    x = jnp.transpose(x_nchw, (0, 2, 3, 1)).astype(jnp.bfloat16)  # NCHW -> NHWC bf16
    n = x.shape[0]
    for p in params:
        l = p['layer']

        # Zero-pad channels to the layer's padded Cin (padded channels hit zero
        # weight rows, so results are unchanged).
        c = x.shape[-1]
        if c < p['cin_p']:
            x = jnp.pad(x, ((0, 0), (0, 0), (0, 0), (0, p['cin_p'] - c)))

        cols, ho, wo = im2col_nhwc(x, l['k'], l['k'], l['s'], l['p'])
        m_true = cols.shape[0]
        out_bytes = 4 if p['final'] else 2
        tile_m = _pick_tile_m(m_true, p['k_dim'], p['cout_p'], out_bytes,
                              mem_cfg['budget'], mem_cfg['patch_bufs'])
        m_pad = _round_up(m_true, tile_m)
        if m_pad > m_true:
            cols = jnp.pad(cols, ((0, m_pad - m_true), (0, 0)))  # zero rows: inert

        if l['type'] == 'conv_lrelu':
            y = conv_lrelu_pallas(cols, p['w'], tile_m, mem_cfg)
        elif l['type'] == 'conv_bn_lrelu':
            y = conv_bn_lrelu_pallas(cols, p['w'], tile_m, m_true, mem_cfg)
        else:
            y = matmul_pallas(cols, p['w'], tile_m, mem_cfg)

        # Keep true rows; channel padding (zero, from zero weight columns) is
        # exactly the Cin padding the next layer expects.
        x = y[:m_true].reshape(n, ho, wo, p['cout_p'])

    # Final conv output is (N, 1, 1, hidden_pad) -> flatten + drop channel pad.
    hidden = params[-1]['layer']['cout']
    return x.reshape(n, -1)[:, :hidden].astype(jnp.float32)


# ----------------------------------- main ------------------------------------

if __name__ == "__main__":
    key = jax.random.PRNGKey(0)
    image_size, nf, nc, batch = 16, 4, 3, 2

    params, hidden_size = build_encoder_params(key, image_size, nf,
                                               hidden_size=None, nc=nc)
    x = jax.random.normal(jax.random.fold_in(key, 123),
                          (batch, nc, image_size, image_size), jnp.float32)

    mem_cfg = _tpu_memory_config()
    fwd = jax.jit(lambda xx: encoder_forward(xx, params, mem_cfg))
    out = jax.block_until_ready(fwd(x))

    assert out.shape == (batch, hidden_size), out.shape
    assert out.dtype == jnp.float32
    print("KERNEL_OK")
</pallas_src>

<mosaic_0001>
module attributes {stable_mosaic.version = 11 : i64} {
  func.func @_conv_lrelu_kernel(%arg0: i32, %arg1: memref<128x128xbf16, #tpu.memory_space<vmem>>, %arg2: memref<128x8xbf16, #tpu.memory_space<vmem>>, %arg3: memref<128x8xbf16, #tpu.memory_space<vmem>>) attributes {dimension_semantics = [#tpu.dimension_semantics<parallel>], iteration_bounds = array<i64: 1>, scalar_prefetch = 0 : i64, scratch_operands = 0 : i64, tpu.core_type = #tpu.core_type<tc>, window_params = [{transform_indices = @transform_0, window_bounds = array<i64: 128, 128>}, {pipeline_mode = #tpu.pipeline_mode<synchronous>, transform_indices = @transform_1, window_bounds = array<i64: 128, 8>}, {transform_indices = @transform_2, window_bounds = array<i64: 128, 8>}]} {
    %c0 = arith.constant 0 : index
    %c0_0 = arith.constant 0 : index
    %0 = vector.load %arg1[%c0, %c0_0] : memref<128x128xbf16, #tpu.memory_space<vmem>>, vector<128x128xbf16>
    %c0_1 = arith.constant 0 : index
    %c0_2 = arith.constant 0 : index
    %1 = vector.load %arg2[%c0_1, %c0_2] : memref<128x8xbf16, #tpu.memory_space<vmem>>, vector<128x8xbf16>
    %cst = arith.constant dense<0.000000e+00> : vector<128x8xf32>
    %2 = tpu.matmul %0, %1, %cst {dimension_numbers = #tpu.dot_dimension_numbers<[1], [0], [0], [1], [0, 0, 1, 1], [], []>} : vector<128x128xbf16>, vector<128x8xbf16>, vector<128x8xf32> -> vector<128x8xf32>
    %cst_3 = arith.constant 0.000000e+00 : f32
    %3 = vector.broadcast %cst_3 : f32 to vector<128x8xf32>
    %4 = arith.cmpf ogt, %2, %3 : vector<128x8xf32>
    %cst_4 = arith.constant 2.000000e-01 : f32
    %5 = vector.broadcast %cst_4 : f32 to vector<128x8xf32>
    %6 = arith.mulf %5, %2 : vector<128x8xf32>
    %7 = arith.select %4, %2, %6 : vector<128x8xi1>, vector<128x8xf32>
    %8 = arith.truncf %7 : vector<128x8xf32> to vector<128x8xbf16>
    %c0_5 = arith.constant 0 : index
    %c0_6 = arith.constant 0 : index
    %9 = vector.load %arg3[%c0_5, %c0_6] : memref<128x8xbf16, #tpu.memory_space<vmem>>, vector<128x8xbf16>
    tpu.vector_store %arg3[%c0_5, %c0_6], %8 {strides = array<i32>} : memref<128x8xbf16, #tpu.memory_space<vmem>>, vector<128x8xbf16>,
    return
  }
  func.func @transform_0(%arg0: i32) -> (i32, i32) {
    %c0_i32 = arith.constant 0 : i32
    %c0_i32_0 = arith.constant 0 : i32
    return %arg0, %c0_i32 : i32, i32
  }
  func.func @transform_1(%arg0: i32) -> (i32, i32) {
    %c0_i32 = arith.constant 0 : i32
    %c0_i32_0 = arith.constant 0 : i32
    %c0_i32_1 = arith.constant 0 : i32
    return %c0_i32, %c0_i32_0 : i32, i32
  }
  func.func @transform_2(%arg0: i32) -> (i32, i32) {
    %c0_i32 = arith.constant 0 : i32
    %c0_i32_0 = arith.constant 0 : i32
    return %arg0, %c0_i32 : i32, i32
  }
}

module attributes {stable_mosaic.version = 11 : i64} {
  func.func @kernel(%arg0: i32, %arg1: memref<32x128xbf16, #tpu.memory_space<vmem>>, %arg2: memref<128x8xbf16, #tpu.memory_space<vmem>>, %arg3: memref<32x8xbf16, #tpu.memory_space<vmem>>) attributes {dimension_semantics = [#tpu.dimension_semantics<arbitrary>], iteration_bounds = array<i64: 1>, scalar_prefetch = 0 : i64, scratch_operands = 0 : i64, tpu.core_type = #tpu.core_type<tc>, window_params = [{transform_indices = @transform_0, window_bounds = array<i64: 32, 128>}, {pipeline_mode = #tpu.pipeline_mode<synchronous>, transform_indices = @transform_1, window_bounds = array<i64: 128, 8>}, {transform_indices = @transform_2, window_bounds = array<i64: 32, 8>}]} {
    %c0 = arith.constant 0 : index
    %c0_0 = arith.constant 0 : index
    %0 = vector.load %arg1[%c0, %c0_0] : memref<32x128xbf16, #tpu.memory_space<vmem>>, vector<32x128xbf16>
    %c0_1 = arith.constant 0 : index
    %c0_2 = arith.constant 0 : index
    %1 = vector.load %arg2[%c0_1, %c0_2] : memref<128x8xbf16, #tpu.memory_space<vmem>>, vector<128x8xbf16>
    %cst = arith.constant dense<0.000000e+00> : vector<32x8xf32>
    %2 = tpu.matmul %0, %1, %cst {dimension_numbers = #tpu.dot_dimension_numbers<[1], [0], [0], [1], [0, 0, 1, 1], [], []>} : vector<32x128xbf16>, vector<128x8xbf16>, vector<32x8xf32> -> vector<32x8xf32>
    %cst_3 = arith.constant dense<0.000000e+00> : vector<8xf32>
    %3 = vector.multi_reduction <add>, %2, %cst_3 [0] : vector<32x8xf32> to vector<8xf32>
    %4 = vector.shape_cast %3 : vector<8xf32> to vector<1x8xf32>
    %cst_4 = arith.constant 3.125000e-02 : f32
    %5 = vector.broadcast %cst_4 : f32 to vector<1x8xf32>
    %6 = arith.mulf %4, %5 : vector<1x8xf32>
    %7 = arith.mulf %2, %2 : vector<32x8xf32>
    %cst_5 = arith.constant dense<0.000000e+00> : vector<8xf32>
    %8 = vector.multi_reduction <add>, %7, %cst_5 [0] : vector<32x8xf32> to vector<8xf32>
    %9 = vector.shape_cast %8 : vector<8xf32> to vector<1x8xf32>
    %cst_6 = arith.constant 3.125000e-02 : f32
    %10 = vector.broadcast %cst_6 : f32 to vector<1x8xf32>
    %11 = arith.mulf %9, %10 : vector<1x8xf32>
    %12 = arith.mulf %6, %6 : vector<1x8xf32>
    %13 = arith.subf %11, %12 : vector<1x8xf32>
    %cst_7 = arith.constant 0.000000e+00 : f32
    %14 = vector.broadcast %cst_7 : f32 to vector<1x8xf32>
    %15 = arith.maximumf %13, %14 : vector<1x8xf32>
    %cst_8 = arith.constant 9.99999974E-6 : f32
    %16 = vector.broadcast %cst_8 : f32 to vector<1x8xf32>
    %17 = arith.addf %15, %16 : vector<1x8xf32>
    %18 = math.rsqrt %17 : vector<1x8xf32>
    %19 = vector.broadcast %6 : vector<1x8xf32> to vector<32x8xf32>
    %20 = arith.subf %2, %19 : vector<32x8xf32>
    %21 = vector.broadcast %18 : vector<1x8xf32> to vector<32x8xf32>
    %22 = arith.mulf %20, %21 : vector<32x8xf32>
    %cst_9 = arith.constant 0.000000e+00 : f32
    %23 = vector.broadcast %cst_9 : f32 to vector<32x8xf32>
    %24 = arith.cmpf ogt, %22, %23 : vector<32x8xf32>
    %cst_10 = arith.constant 2.000000e-01 : f32
    %25 = vector.broadcast %cst_10 : f32 to vector<32x8xf32>
    %26 = arith.mulf %25, %22 : vector<32x8xf32>
    %27 = arith.select %24, %22, %26 : vector<32x8xi1>, vector<32x8xf32>
    %28 = arith.truncf %27 : vector<32x8xf32> to vector<32x8xbf16>
    %c0_11 = arith.constant 0 : index
    %c0_12 = arith.constant 0 : index
    %29 = vector.load %arg3[%c0_11, %c0_12] : memref<32x8xbf16, #tpu.memory_space<vmem>>, vector<32x8xbf16>
    tpu.vector_store %arg3[%c0_11, %c0_12], %28 {strides = array<i32>} : memref<32x8xbf16, #tpu.memory_space<vmem>>, vector<32x8xbf16>,
    return
  }
  func.func @transform_0(%arg0: i32) -> (i32, i32) {
    %c0_i32 = arith.constant 0 : i32
    %c0_i32_0 = arith.constant 0 : i32
    return %arg0, %c0_i32 : i32, i32
  }
  func.func @transform_1(%arg0: i32) -> (i32, i32) {
    %c0_i32 = arith.constant 0 : i32
    %c0_i32_0 = arith.constant 0 : i32
    %c0_i32_1 = arith.constant 0 : i32
    return %c0_i32, %c0_i32_0 : i32, i32
  }
  func.func @transform_2(%arg0: i32) -> (i32, i32) {
    %c0_i32 = arith.constant 0 : i32
    %c0_i32_0 = arith.constant 0 : i32
    return %arg0, %c0_i32 : i32, i32
  }
}

module attributes {stable_mosaic.version = 11 : i64} {
  func.func @_matmul_kernel(%arg0: i32, %arg1: memref<16x128xbf16, #tpu.memory_space<vmem>>, %arg2: memref<128x8xbf16, #tpu.memory_space<vmem>>, %arg3: memref<16x8xf32, #tpu.memory_space<vmem>>) attributes {dimension_semantics = [#tpu.dimension_semantics<parallel>], iteration_bounds = array<i64: 1>, scalar_prefetch = 0 : i64, scratch_operands = 0 : i64, tpu.core_type = #tpu.core_type<tc>, window_params = [{transform_indices = @transform_0, window_bounds = array<i64: 16, 128>}, {pipeline_mode = #tpu.pipeline_mode<synchronous>, transform_indices = @transform_1, window_bounds = array<i64: 128, 8>}, {transform_indices = @transform_2, window_bounds = array<i64: 16, 8>}]} {
    %c0 = arith.constant 0 : index
    %c0_0 = arith.constant 0 : index
    %0 = vector.load %arg1[%c0, %c0_0] : memref<16x128xbf16, #tpu.memory_space<vmem>>, vector<16x128xbf16>
    %c0_1 = arith.constant 0 : index
    %c0_2 = arith.constant 0 : index
    %1 = vector.load %arg2[%c0_1, %c0_2] : memref<128x8xbf16, #tpu.memory_space<vmem>>, vector<128x8xbf16>
    %cst = arith.constant dense<0.000000e+00> : vector<16x8xf32>
    %2 = tpu.matmul %0, %1, %cst {dimension_numbers = #tpu.dot_dimension_numbers<[1], [0], [0], [1], [0, 0, 1, 1], [], []>} : vector<16x128xbf16>, vector<128x8xbf16>, vector<16x8xf32> -> vector<16x8xf32>
    %c0_3 = arith.constant 0 : index
    %c0_4 = arith.constant 0 : index
    %3 = vector.load %arg3[%c0_3, %c0_4] : memref<16x8xf32, #tpu.memory_space<vmem>>, vector<16x8xf32>
    tpu.vector_store %arg3[%c0_3, %c0_4], %2 {strides = array<i32>} : memref<16x8xf32, #tpu.memory_space<vmem>>, vector<16x8xf32>,
    return
  }
  func.func @transform_0(%arg0: i32) -> (i32, i32) {
    %c0_i32 = arith.constant 0 : i32
    %c0_i32_0 = arith.constant 0 : i32
    return %arg0, %c0_i32 : i32, i32
  }
  func.func @transform_1(%arg0: i32) -> (i32, i32) {
    %c0_i32 = arith.constant 0 : i32
    %c0_i32_0 = arith.constant 0 : i32
    %c0_i32_1 = arith.constant 0 : i32
    return %c0_i32, %c0_i32_0 : i32, i32
  }
  func.func @transform_2(%arg0: i32) -> (i32, i32) {
    %c0_i32 = arith.constant 0 : i32
    %c0_i32_0 = arith.constant 0 : i32
    return %arg0, %c0_i32 : i32, i32
  }
}

</mosaic_0001>

<bundles_post_ra>
// kernel: _lambda_.3
= control target key start
LH: loop header
LB: loop body
LE: loop exit
PB: predicated region body
PF: predicated region fallthrough
CT: control target
= control target key end

     0   :  { %vm349_vm2 = vcmask 60416   ;;  %s626_s1 = inlined_call_operand.vmem [shape: bf16[128,8], index: 1, kind: input, shape index: {}]   ;;  %s627_s0 = inlined_call_operand.vmem [shape: bf16[128,128], index: 0, kind: input, shape index: {}]   ;;  %s628_s2 = inlined_call_operand.vmem [shape: bf16[128,8], index: 2, kind: output, shape index: {}]  }
   0x1   :  { %v482_v0 = vld [vmem:[%s626_s1] sm:$0xff]   ;;  %v483_v1 = vld [vmem:[%s626_s1 + $0x8] sm:$0xff]   ;;  %v484_v2 = vld [vmem:[%s626_s1 + $0x10] sm:$0xff]  }
   0x2   :  { %434 = vmatprep.subr.bf16.mxu0 %v482_v0  ;;  %466 = vmatprep.subr.bf16.mxu1 %v482_v0  ;;  %v485_v3 = vld [vmem:[%s626_s1 + $0x18] sm:$0xff]   ;;  %v490_v4 = vld [vmem:[%s627_s0] sm:$0xff]   ;;  %v487_v7 = vld [vmem:[%s626_s1 + $0x28] sm:$0xff]  }
   0x3   :  { %435 = vmatpush3.bf16.msra.mxu0 %v482_v0  ;;  %474 = vmatpush3.bf16.msra.mxu1 %v482_v0  ;;  %v491_v5 = vld [vmem:[%s627_s0 + $0x20] sm:$0xff]   ;;  %v488_v8 = vld [vmem:[%s626_s1 + $0x30] sm:$0xff]   ;;  %v489_v9 = vld [vmem:[%s626_s1 + $0x38] sm:$0xff]  }
   0x4   :  { %436 = vmatprep.subr.bf16.mxu0 %v483_v1  ;;  %467 = vmatprep.subr.bf16.mxu1 %v483_v1  ;;  %v486_v6 = vld [vmem:[%s626_s1 + $0x20] sm:$0xff]   ;;  %v492_v10 = vld [vmem:[%s627_s0 + $0x8] sm:$0xff]   ;;  %v494_v12 = vld [vmem:[%s627_s0 + $0x10] sm:$0xff]  }
   0x5   :  { %450 = vmatprep.mubr.bf16.mxu0 %v490_v4  ;;  %458 = vmatprep.mubr.bf16.mxu1 %v491_v5  ;;  %v493_v11 = vld [vmem:[%s627_s0 + $0x28] sm:$0xff]   ;;  %v495_v13 = vld [vmem:[%s627_s0 + $0x30] sm:$0xff]   ;;  %v496_v14 = vld [vmem:[%s627_s0 + $0x18] sm:$0xff]  }
   0x6   :  { %v497_v15 = vld [vmem:[%s627_s0 + $0x38] sm:$0xff]  }
   0x7   :  { %437 = vmatpush3.bf16.msra.mxu0 %v483_v1  ;;  %475 = vmatpush3.bf16.msra.mxu1 %v483_v1 }
   0x8   :  { %438 = vmatprep.subr.bf16.mxu0 %v484_v2  ;;  %468 = vmatprep.subr.bf16.mxu1 %v484_v2 }
   0xb   :  { %439 = vmatpush3.bf16.msra.mxu0 %v484_v2  ;;  %476 = vmatpush3.bf16.msra.mxu1 %v484_v2 }
   0xc   :  { %440 = vmatprep.subr.bf16.mxu0 %v485_v3  ;;  %469 = vmatprep.subr.bf16.mxu1 %v485_v3 }
   0xf   :  { %441 = vmatpush3.bf16.msra.mxu0 %v485_v3  ;;  %477 = vmatpush3.bf16.msra.mxu1 %v485_v3 }
  0x10   :  { %442 = vmatprep.subr.bf16.mxu0 %v486_v6  ;;  %470 = vmatprep.subr.bf16.mxu1 %v486_v6 }
  0x13   :  { %443 = vmatpush3.bf16.msra.mxu0 %v486_v6  ;;  %478 = vmatpush3.bf16.msra.mxu1 %v486_v6 }
  0x14   :  { %444 = vmatprep.subr.bf16.mxu0 %v487_v7  ;;  %471 = vmatprep.subr.bf16.mxu1 %v487_v7 }
  0x17   :  { %445 = vmatpush3.bf16.msra.mxu0 %v487_v7  ;;  %479 = vmatpush3.bf16.msra.mxu1 %v487_v7 }
  0x18   :  { %446 = vmatprep.subr.bf16.mxu0 %v488_v8  ;;  %472 = vmatprep.subr.bf16.mxu1 %v488_v8 }
  0x1b   :  { %447 = vmatpush3.bf16.msra.mxu0 %v488_v8  ;;  %480 = vmatpush3.bf16.msra.mxu1 %v488_v8 }
  0x1c   :  { %448 = vmatprep.subr.bf16.mxu0 %v489_v9  ;;  %473 = vmatprep.subr.bf16.mxu1 %v489_v9 }
  0x1f   :  { %449 = vmatpush3.bf16.msra.mxu0 %v489_v9  ;;  %481 = vmatpush3.bf16.msra.mxu1 %v489_v9 }
  0x22   :  { %451 = vmatmul.mubr.bf16.vlgmr.msra.gmra.mrb[0].mxu0 %v492_v10  ;;  %459 = vmatmul.mubr.bf16.vlgmr.msra.gmra.mrb[0].mxu1 %v493_v11 }
  0x23   :  { %454 = vmatprep.mubr.bf16.mxu0 %v494_v12  ;;  %462 = vmatprep.mubr.bf16.mxu1 %v495_v13 }
  0x2a   :  { %455 = vmatmul.mubr.bf16.gmra.mrb[4].mxu0 %v496_v14  ;;  %463 = vmatmul.mubr.bf16.gmra.mrb[4].mxu1 %v497_v15 }
  0xf5   :  { %v452_v16 = vpop.f32.mrb[0].mxu0  ;;  %v460_v17 = vpop.f32.mrb[0].mxu1 }
  0xf6   :  { %vm239_vm0 = vcmp.gt.f32.partialorder %v452_v16, 0.0  ;;  %v255_v18 = vmul.f32 0.2, %v452_v16  ;;  %vm247_vm1 = vcmp.gt.f32.partialorder %v460_v17, 0.0  ;;  %v263_v19 = vmul.f32 0.2, %v460_v17 }
  0xf7   :  { %v174_v20 = vpop.f32.mrb[1].mxu0  ;;  %v206_v21 = vpop.f32.mrb[1].mxu1 }
  0xf8   :  { %v271_v22 = vsel %vm239_vm0, %v452_v16, %v255_v18  ;;  %v279_v23 = vsel %vm247_vm1, %v460_v17, %v263_v19  ;;  %vm237_vm3 = vcmp.gt.f32.partialorder %v174_v20, 0.0  ;;  %v253_v24 = vmul.f32 0.2, %v174_v20  ;;  %v453_v25 = vpop.f32.mrb[2].mxu0  ;;  %v461_v26 = vpop.f32.mrb[2].mxu1 }
  0xf9   :  { %v404_v27 = vpack.c.bf16 %v271_v22, %v271_v22  ;;  %v412_v28 = vpack.c.bf16 %v279_v23, %v279_v23  ;;  %vm245_vm4 = vcmp.gt.f32.partialorder %v206_v21, 0.0  ;;  %v261_v29 = vmul.f32 0.2, %v206_v21  ;;  %v177_v30 = vpop.f32.mrb[3].mxu0  ;;  %v209_v31 = vpop.f32.mrb[3].mxu1 }
  0xfa   :  { %v269_v32 = vsel %vm237_vm3, %v174_v20, %v253_v24  ;;  %vm240_vm5 = vcmp.gt.f32.partialorder %v453_v25, 0.0  ;;  %v256_v33 = vmul.f32 0.2, %v453_v25  ;;  %vm248_vm6 = vcmp.gt.f32.partialorder %v461_v26, 0.0 }
  0xfb   :  { %352 = vst.msk [vmem:[%s628_s2 + $0x8] sm:$0xf] %vm349_vm2, %v404_v27  ;;  %360 = vst.msk [vmem:[%s628_s2 + $0x28] sm:$0xf] %vm349_vm2, %v412_v28  ;;  %v402_v34 = vpack.c.bf16 %v269_v32, %v269_v32  ;;  %v277_v35 = vsel %vm245_vm4, %v206_v21, %v261_v29  ;;  %v264_v36 = vmul.f32 0.2, %v461_v26 }
  0xfc   :  { %vm238_vm7 = vcmp.gt.f32.partialorder %v177_v30, 0.0  ;;  %v410_v37 = vpack.c.bf16 %v277_v35, %v277_v35  ;;  %v272_v38 = vsel %vm240_vm5, %v453_v25, %v256_v33  ;;  %v254_v39 = vmul.f32 0.2, %v177_v30 }
  0xfd   :  { %vm246_vm8 = vcmp.gt.f32.partialorder %v209_v31, 0.0  ;;  %350 = vst.msk [vmem:[%s628_s2] sm:$0xf] %vm349_vm2, %v402_v34  ;;  %v405_v40 = vpack.c.bf16 %v272_v38, %v272_v38  ;;  %v280_v41 = vsel %vm248_vm6, %v461_v26, %v264_v36  ;;  %v262_v42 = vmul.f32 0.2, %v209_v31  ;;  %v456_v43 = vpop.f32.mrb[4].mxu0 }
  0xfe   :  { %v464_v44 = vpop.f32.mrb[4].mxu1  ;;  %358 = vst.msk [vmem:[%s628_s2 + $0x20] sm:$0xf] %vm349_vm2, %v410_v37  ;;  %v413_v45 = vpack.c.bf16 %v280_v41, %v280_v41  ;;  %v270_v46 = vsel %vm238_vm7, %v177_v30, %v254_v39  ;;  %vm243_vm9 = vcmp.gt.f32.partialorder %v456_v43, 0.0  ;;  %v259_v47 = vmul.f32 0.2, %v456_v43 }
  0xff   :  { %v190_v48 = vpop.f32.mrb[5].mxu0  ;;  %v222_v49 = vpop.f32.mrb[5].mxu1  ;;  %353 = vst.msk [vmem:[%s628_s2 + $0xc] sm:$0xf] %vm349_vm2, %v405_v40  ;;  %v403_v50 = vpack.c.bf16 %v270_v46, %v270_v46  ;;  %v278_v51 = vsel %vm246_vm8, %v209_v31, %v262_v42  ;;  %vm251_vm10 = vcmp.gt.f32.partialorder %v464_v44, 0.0 }
 0x100   :  { %v267_v52 = vmul.f32 0.2, %v464_v44  ;;  %v457_v53 = vpop.f32.mrb[6].mxu0  ;;  %v465_v54 = vpop.f32.mrb[6].mxu1  ;;  %361 = vst.msk [vmem:[%s628_s2 + $0x2c] sm:$0xf] %vm349_vm2, %v413_v45  ;;  %v411_v55 = vpack.c.bf16 %v278_v51, %v278_v51  ;;  %v275_v56 = vsel %vm243_vm9, %v456_v43, %v259_v47 }
 0x101   :  { %vm241_vm11 = vcmp.gt.f32.partialorder %v190_v48, 0.0  ;;  %v257_v57 = vmul.f32 0.2, %v190_v48  ;;  %v193_v58 = vpop.f32.mrb[7].mxu0  ;;  %v225_v59 = vpop.f32.mrb[7].mxu1  ;;  %v408_v60 = vpack.c.bf16 %v275_v56, %v275_v56  ;;  %vm249_vm12 = vcmp.gt.f32.partialorder %v222_v49, 0.0 }
 0x102   :  { %351 = vst.msk [vmem:[%s628_s2 + $0x4] sm:$0xf] %vm349_vm2, %v403_v50  ;;  %v283_v61 = vsel %vm251_vm10, %v464_v44, %v267_v52  ;;  %v265_v62 = vmul.f32 0.2, %v222_v49  ;;  %359 = vst.msk [vmem:[%s628_s2 + $0x24] sm:$0xf] %vm349_vm2, %v411_v55 }
 0x103   :  { %v416_v63 = vpack.c.bf16 %v283_v61, %v283_v61  ;;  %v273_v0 = vsel %vm241_vm11, %v190_v48, %v257_v57  ;;  %vm244_vm13 = vcmp.gt.f32.partialorder %v457_v53, 0.0  ;;  %v260_v1 = vmul.f32 0.2, %v457_v53  ;;  %356 = vst.msk [vmem:[%s628_s2 + $0x18] sm:$0xf] %vm349_vm2, %v408_v60 }
 0x104   :  { %v406_v2 = vpack.c.bf16 %v273_v0, %v273_v0  ;;  %v281_v3 = vsel %vm249_vm12, %v222_v49, %v265_v62  ;;  %vm252_vm14 = vcmp.gt.f32.partialorder %v465_v54, 0.0  ;;  %v268_v4 = vmul.f32 0.2, %v465_v54 }
 0x105   :  { %364 = vst.msk [vmem:[%s628_s2 + $0x38] sm:$0xf] %vm349_vm2, %v416_v63  ;;  %v414_v5 = vpack.c.bf16 %v281_v3, %v281_v3  ;;  %v276_v6 = vsel %vm244_vm13, %v457_v53, %v260_v1  ;;  %vm242_vm15 = vcmp.gt.f32.partialorder %v193_v58, 0.0  ;;  %v258_v7 = vmul.f32 0.2, %v193_v58 }
 0x106   :  { %354 = vst.msk [vmem:[%s628_s2 + $0x10] sm:$0xf] %vm349_vm2, %v406_v2  ;;  %v409_v8 = vpack.c.bf16 %v276_v6, %v276_v6  ;;  %v284_v9 = vsel %vm252_vm14, %v465_v54, %v268_v4  ;;  %vm250_vm0 = vcmp.gt.f32.partialorder %v225_v59, 0.0  ;;  %v266_v10 = vmul.f32 0.2, %v225_v59 }
 0x107   :  { %362 = vst.msk [vmem:[%s628_s2 + $0x30] sm:$0xf] %vm349_vm2, %v414_v5  ;;  %v417_v11 = vpack.c.bf16 %v284_v9, %v284_v9  ;;  %v274_v12 = vsel %vm242_vm15, %v193_v58, %v258_v7 }
 0x108   :  { %357 = vst.msk [vmem:[%s628_s2 + $0x1c] sm:$0xf] %vm349_vm2, %v409_v8  ;;  %v407_v13 = vpack.c.bf16 %v274_v12, %v274_v12  ;;  %v282_v14 = vsel %vm250_vm0, %v225_v59, %v266_v10 }
 0x109   :  { %365 = vst.msk [vmem:[%s628_s2 + $0x3c] sm:$0xf] %vm349_vm2, %v417_v11  ;;  %v415_v15 = vpack.c.bf16 %v282_v14, %v282_v14 }
 0x10a   :  { %355 = vst.msk [vmem:[%s628_s2 + $0x14] sm:$0xf] %vm349_vm2, %v407_v13 }
 0x10b   :  { %363 = vst.msk [vmem:[%s628_s2 + $0x34] sm:$0xf] %vm349_vm2, %v415_v15 }

// kernel: _lambda_.4
= control target key start
LH: loop header
LB: loop body
LE: loop exit
PB: predicated region body
PF: predicated region fallthrough
CT: control target
= control target key end

     0   :  { %vm141_vm0 = vcmask 64512   ;;  %vm215_vm5 = vcmask 60416   ;;  %s349_s1 = inlined_call_operand.vmem [shape: bf16[128,8], index: 1, kind: input, shape index: {}]   ;;  %s350_s0 = inlined_call_operand.vmem [shape: bf16[32,128], index: 0, kind: input, shape index: {}]   ;;  %s351_s2 = inlined_call_operand.vmem [shape: bf16[32,8], index: 2, kind: output, shape index: {}]  }
   0x1   :  { %v272_v0 = vld [vmem:[%s349_s1] sm:$0xff]   ;;  %v273_v1 = vld [vmem:[%s349_s1 + $0x8] sm:$0xff]   ;;  %v274_v2 = vld [vmem:[%s349_s1 + $0x10] sm:$0xff]  }
   0x2   :  { %252 = vmatprep.subr.bf16.mxu0 %v272_v0  ;;  %v275_v3 = vld [vmem:[%s349_s1 + $0x18] sm:$0xff]   ;;  %v280_v4 = vld [vmem:[%s350_s0] sm:$0xff]   ;;  %v277_v6 = vld [vmem:[%s349_s1 + $0x28] sm:$0xff]  }
   0x3   :  { %253 = vmatpush3.bf16.msra.mxu0 %v272_v0  ;;  %268 = vmatprep.mubr.bf16.mxu0 %v280_v4  ;;  %v276_v5 = vld [vmem:[%s349_s1 + $0x20] sm:$0xff]   ;;  %v278_v7 = vld [vmem:[%s349_s1 + $0x30] sm:$0xff]   ;;  %v279_v8 = vld [vmem:[%s349_s1 + $0x38] sm:$0xff]  }
   0x4   :  { %254 = vmatprep.subr.bf16.mxu0 %v273_v1  ;;  %v281_v9 = vld [vmem:[%s350_s0 + $0x8] sm:$0xff]  }
   0x7   :  { %255 = vmatpush3.bf16.msra.mxu0 %v273_v1 }
   0x8   :  { %256 = vmatprep.subr.bf16.mxu0 %v274_v2 }
   0xb   :  { %257 = vmatpush3.bf16.msra.mxu0 %v274_v2 }
   0xc   :  { %258 = vmatprep.subr.bf16.mxu0 %v275_v3 }
   0xf   :  { %259 = vmatpush3.bf16.msra.mxu0 %v275_v3 }
  0x10   :  { %260 = vmatprep.subr.bf16.mxu0 %v276_v5 }
  0x13   :  { %261 = vmatpush3.bf16.msra.mxu0 %v276_v5 }
  0x14   :  { %262 = vmatprep.subr.bf16.mxu0 %v277_v6 }
  0x17   :  { %263 = vmatpush3.bf16.msra.mxu0 %v277_v6 }
  0x18   :  { %264 = vmatprep.subr.bf16.mxu0 %v278_v7 }
  0x1b   :  { %265 = vmatpush3.bf16.msra.mxu0 %v278_v7 }
  0x1c   :  { %266 = vmatprep.subr.bf16.mxu0 %v279_v8 }
  0x1f   :  { %267 = vmatpush3.bf16.msra.mxu0 %v279_v8 }
  0x22   :  { %269 = vmatmul.mubr.bf16.vlgmr.msra.gmra.mrb[0].mxu0 %v281_v9 }
  0xf5   :  { %v270_v10 = vpop.f32.mrb[0].mxu0 }
  0xf6   :  { %v126_v11 = vpop.f32.mrb[1].mxu0  ;;  %v158_v15 = vmul.f32 %v270_v10, %v270_v10  ;;  %v145_v20 = vsel %vm141_vm0, %v270_v10, 0.0 }
  0xf7   :  { %v156_v12 = vmul.f32 %v126_v11, %v126_v11  ;;  %v271_v13 = vpop.f32.mrb[2].mxu0  ;;  %v142_v16 = vsel %vm141_vm0, %v126_v11, 0.0 }
  0xf8   :  { %v129_v14 = vpop.f32.mrb[3].mxu0  ;;  %v159_v22 = vmul.f32 %v271_v13, %v271_v13  ;;  %v163_v26 = vsel %vm141_vm0, %v158_v15, 0.0  ;;  %v147_v27 = vsel %vm141_vm0, %v271_v13, 0.0 }
  0xf9   :  { %v143_v17 = vsel %vm141_vm0, %v129_v14, 0.0  ;;  %v157_v18 = vmul.f32 %v129_v14, %v129_v14  ;;  %v160_v21 = vsel %vm141_vm0, %v156_v12, 0.0 }
  0xfa   :  { %v144_v19 = vadd.f32 %v143_v17, %v142_v16  ;;  %v165_v30 = vsel %vm141_vm0, %v159_v22, 0.0 }
  0xfb   :  { %v161_v23 = vsel %vm141_vm0, %v157_v18, 0.0 }
  0xfc   :  { %v146_v24 = vadd.f32 %v145_v20, %v144_v19  ;;  %v162_v25 = vadd.f32 %v161_v23, %v160_v21 }
  0xfe   :  { %v148_v28 = vadd.f32 %v147_v27, %v146_v24  ;;  %v164_v29 = vadd.f32 %v163_v26, %v162_v25 }
 0x100   :  { %v149_v31 = vrot.slane %v148_v28, 4  ;;  %v166_v32 = vadd.f32 %v165_v30, %v164_v29 }
 0x102   :  { %v150_v33 = vadd.f32 %v149_v31, %v148_v28  ;;  %v167_v34 = vrot.slane %v166_v32, 4 }
 0x104   :  { %v151_v35 = vrot.slane %v150_v33, 2  ;;  %v168_v36 = vadd.f32 %v167_v34, %v166_v32 }
 0x106   :  { %v152_v37 = vadd.f32 %v151_v35, %v150_v33  ;;  %v169_v38 = vrot.slane %v168_v36, 2 }
 0x108   :  { %v153_v39 = vrot.slane %v152_v37, 1  ;;  %v170_v40 = vadd.f32 %v169_v38, %v168_v36 }
 0x10a   :  { %v154_v41 = vadd.f32 %v153_v39, %v152_v37  ;;  %v171_v42 = vrot.slane %v170_v40, 1 }
 0x10c   :  { %v155_v43 = vmul.f32 0.03125, %v154_v41  ;;  %v172_v44 = vadd.f32 %v171_v42, %v170_v40 }
 0x10e   :  { %v173_v45 = vmul.f32 0.03125, %v172_v44  ;;  %v174_v46 = vmul.f32 %v155_v43, %v155_v43  ;;  %v179_v47 = vsub.f32 %v126_v11, %v155_v43  ;;  %v180_v48 = vsub.f32 %v129_v14, %v155_v43 }
 0x10f   :  { %v181_v49 = vsub.f32 %v270_v10, %v155_v43  ;;  %v182_v50 = vsub.f32 %v271_v13, %v155_v43 }
 0x110   :  { %v175_v51 = vsub.f32 %v173_v45, %v174_v46 }
 0x112   :  { %v176_v52 = vmax.f32 %v175_v51, 0.0 }
 0x114   :  { %v177_v53 = vadd.f32 1e-05, %v176_v52 }
 0x116   :  { %282 = vrsqrt.f32 %v177_v53 }
 0x120   :  { %v283_v54 = vpop.eup %282 }
 0x121   :  { %v183_v55 = vmul.f32 %v283_v54, %v179_v47  ;;  %v184_v56 = vmul.f32 %v283_v54, %v180_v48  ;;  %v185_v57 = vmul.f32 %v283_v54, %v181_v49  ;;  %v186_v58 = vmul.f32 %v283_v54, %v182_v50 }
 0x123   :  { %vm187_vm1 = vcmp.gt.f32.partialorder %v183_v55, 0.0  ;;  %vm188_vm2 = vcmp.gt.f32.partialorder %v184_v56, 0.0  ;;  %vm189_vm3 = vcmp.gt.f32.partialorder %v185_v57, 0.0  ;;  %vm190_vm4 = vcmp.gt.f32.partialorder %v186_v58, 0.0 }
 0x124   :  { %v191_v59 = vmul.f32 0.2, %v183_v55  ;;  %v192_v60 = vmul.f32 0.2, %v184_v56  ;;  %v193_v61 = vmul.f32 0.2, %v185_v57 }
 0x125   :  { %v194_v62 = vmul.f32 0.2, %v186_v58 }
 0x126   :  { %v195_v63 = vsel %vm187_vm1, %v183_v55, %v191_v59  ;;  %v196_v0 = vsel %vm188_vm2, %v184_v56, %v192_v60  ;;  %v197_v1 = vsel %vm189_vm3, %v185_v57, %v193_v61 }
 0x127   :  { %v198_v2 = vsel %vm190_vm4, %v186_v58, %v194_v62  ;;  %v238_v3 = vpack.c.bf16 %v195_v63, %v195_v63  ;;  %v239_v4 = vpack.c.bf16 %v196_v0, %v196_v0  ;;  %v240_v5 = vpack.c.bf16 %v197_v1, %v197_v1 }
 0x128   :  { %v241_v6 = vpack.c.bf16 %v198_v2, %v198_v2 }
 0x129   :  { %216 = vst.msk [vmem:[%s351_s2] sm:$0xf] %vm215_vm5, %v238_v3  ;;  %217 = vst.msk [vmem:[%s351_s2 + $0x4] sm:$0xf] %vm215_vm5, %v239_v4 }
 0x12a   :  { %218 = vst.msk [vmem:[%s351_s2 + $0x8] sm:$0xf] %vm215_vm5, %v240_v5  ;;  %219 = vst.msk [vmem:[%s351_s2 + $0xc] sm:$0xf] %vm215_vm5, %v241_v6 }

// kernel: _lambda_.5
= control target key start
LH: loop header
LB: loop body
LE: loop exit
PB: predicated region body
PF: predicated region fallthrough
CT: control target
= control target key end

     0   :  { %v181_v0 = vmov 0.0   ;;  %vm182_vm0 = vmmov 0   ;;  %vm125_vm1 = vcmask 64512   ;;  %s231_s1 = inlined_call_operand.vmem [shape: bf16[128,8], index: 1, kind: input, shape index: {}]   ;;  %s232_s0 = inlined_call_operand.vmem [shape: bf16[16,128], index: 0, kind: input, shape index: {}]   ;;  %s233_s2 = inlined_call_operand.vmem [shape: f32[16,8], index: 2, kind: output, shape index: {}]  }
   0x1   :  { %150 = vmatprep.subr.bf16.mxu0 %v181_v0  ;;  %v172_v1 = vld [vmem:[%s231_s1] sm:$0xff]   ;;  %166 = vmatprep.mubr.msk.bf16.mxu0 %vm182_vm0, %v181_v0  ;;  %v173_v2 = vld [vmem:[%s231_s1 + $0x8] sm:$0xff]   ;;  %v174_v3 = vld [vmem:[%s231_s1 + $0x10] sm:$0xff]  }
   0x2   :  { %151 = vmatpush3.bf16.msra.mxu0 %v172_v1  ;;  %v175_v4 = vld [vmem:[%s231_s1 + $0x18] sm:$0xff]   ;;  %v176_v5 = vld [vmem:[%s231_s1 + $0x20] sm:$0xff]   ;;  %v177_v6 = vld [vmem:[%s231_s1 + $0x28] sm:$0xff]  }
   0x3   :  { %152 = vmatprep.subr.bf16.mxu0 %v181_v0  ;;  %v178_v7 = vld [vmem:[%s231_s1 + $0x30] sm:$0xff]   ;;  %v179_v8 = vld [vmem:[%s231_s1 + $0x38] sm:$0xff]   ;;  %v180_v9 = vld [vmem:[%s232_s0] sm:$0xff]  }
   0x6   :  { %153 = vmatpush3.bf16.msra.mxu0 %v173_v2 }
   0x7   :  { %154 = vmatprep.subr.bf16.mxu0 %v181_v0 }
   0xa   :  { %155 = vmatpush3.bf16.msra.mxu0 %v174_v3 }
   0xb   :  { %156 = vmatprep.subr.bf16.mxu0 %v181_v0 }
   0xe   :  { %157 = vmatpush3.bf16.msra.mxu0 %v175_v4 }
   0xf   :  { %158 = vmatprep.subr.bf16.mxu0 %v181_v0 }
  0x12   :  { %159 = vmatpush3.bf16.msra.mxu0 %v176_v5 }
  0x13   :  { %160 = vmatprep.subr.bf16.mxu0 %v181_v0 }
  0x16   :  { %161 = vmatpush3.bf16.msra.mxu0 %v177_v6 }
  0x17   :  { %162 = vmatprep.subr.bf16.mxu0 %v181_v0 }
  0x1a   :  { %163 = vmatpush3.bf16.msra.mxu0 %v178_v7 }
  0x1b   :  { %164 = vmatprep.subr.bf16.mxu0 %v181_v0 }
  0x1e   :  { %165 = vmatpush3.bf16.msra.mxu0 %v179_v8 }
  0x21   :  { %167 = vmatmul.mubr.bf16.vlgmr.msra.gmra.mrb[0].mxu0 %v180_v9 }
  0xf4   :  { %v118_v10 = vpop.f32.mrb[0].mxu0 }
  0xf5   :  { %126 = vst.msk [vmem:[%s233_s2] sm:$0xff] %vm125_vm1, %v118_v10  ;;  %v168_v11 = vpop.f32.mrb[1].mxu0 }
  0xf6   :  { %v121_v12 = vpop.f32.mrb[2].mxu0 }
  0xf7   :  { %127 = vst.msk [vmem:[%s233_s2 + $0x8] sm:$0xff] %vm125_vm1, %v121_v12  ;;  %v169_v13 = vpop.f32.mrb[3].mxu0 }

</bundles_post_ra>
